<compile_context>
chip_gen: v6e
topology: v6e:2x2x1
jax: 0.10.0
libtpu: 0.0.40
codegen_flags: <defaults>
</compile_context>

<pallas_src>
import jax
import jax.numpy as jnp
from jax.experimental import pallas as pl
from jax.experimental.pallas import tpu as pltpu


def _round_up(n, m):
    return ((n + m - 1) // m) * m


def _critic_kernel(x_ref, w1_ref, b1_ref, w2_ref, b2_ref, wv_ref, bv_ref, out_ref):
    # Hidden layer 1: bf16 MXU matmul, f32 accumulate; bias + ReLU in f32 (VPU).
    h = jnp.dot(x_ref[...], w1_ref[...], preferred_element_type=jnp.float32)
    h = jnp.maximum(h + b1_ref[...], 0.0)
    # Hidden layer 2: cast activations to bf16 for the MXU, accumulate in f32.
    h = jnp.dot(h.astype(jnp.bfloat16), w2_ref[...],
                preferred_element_type=jnp.float32)
    h = jnp.maximum(h + b2_ref[...], 0.0)
    # Value head (out_dim == 1): VPU multiply + lane reduction instead of an
    # N=1 MXU matmul. wv is a (1, h2) row, bv is (1, 1).
    v = jnp.sum(h * wv_ref[...], axis=-1, keepdims=True) + bv_ref[...]
    out_ref[...] = v.astype(out_ref.dtype)


def critic_forward(x, params, *, tile_b=256):
    """x: (B, obs_dim) float32 -> (B,) float32."""
    w1, b1, w2, b2, wv, bv = params
    B, obs_dim = x.shape
    h1 = w1.shape[1]
    h2 = w2.shape[1]

    # Choose the batch tile: full (sublane-rounded) batch when small, else
    # tile_b rows per grid step. Pad B up to a multiple of the tile.
    tb = min(tile_b, _round_up(B, 8))
    B_pad = _round_up(B, tb)
    x = x.astype(jnp.bfloat16)
    if B_pad != B:
        x = jnp.pad(x, ((0, B_pad - B), (0, 0)))
    grid = (B_pad // tb,)

    resident = lambda shape: pl.BlockSpec(shape, lambda i: (0,) * len(shape))

    cost = pl.CostEstimate(
        flops=2 * B_pad * (obs_dim * h1 + h1 * h2 + h2),
        transcendentals=0,
        bytes_accessed=(B_pad * obs_dim * 2            # x (bf16)
                        + obs_dim * h1 * 2 + h1 * h2 * 2  # W1, W2 (bf16)
                        + (h1 + h2 + h2 + 1) * 4          # biases + wv (f32)
                        + B_pad * 4),                     # out (f32)
    )

    out = pl.pallas_call(
        _critic_kernel,
        out_shape=jax.ShapeDtypeStruct((B_pad, 1), jnp.float32),
        grid=grid,
        in_specs=[
            pl.BlockSpec((tb, obs_dim), lambda i: (i, 0)),   # x tile (pipelined)
            resident(w1.shape), resident(b1.shape),          # VMEM-resident params
            resident(w2.shape), resident(b2.shape),
            resident(wv.shape), resident(bv.shape),
        ],
        out_specs=pl.BlockSpec((tb, 1), lambda i: (i, 0)),
        compiler_params=pltpu.CompilerParams(
            dimension_semantics=("parallel",)),              # 2-TC shard on v7x
        cost_estimate=cost,
    )(x, w1, b1, w2, b2, wv, bv)

    # TODO(synk): for very large B a lane-dense (B//128, 128) output layout
    # would avoid masked vst stores; irrelevant at small/medium B.
    return out[:B].reshape(-1)  # matches .view(-1)


def init_critic_params(key, obs_dim, hidden_sizes):
    """Deterministic orthogonal init (gain=1) for Linear weights, zero biases,
    mirroring orthogonal_weight_init. Hidden weights stored (in, out) in bf16;
    the value head is kept as a (1, h2) f32 row for the VPU reduction."""
    assert len(hidden_sizes) == 2, "kernel is specialized to two hidden layers"
    orth = jax.nn.initializers.orthogonal()
    dims = [obs_dim] + list(hidden_sizes)
    ws, bs = [], []
    for i in range(len(dims) - 1):
        key, sub = jax.random.split(key)
        w_pt = orth(sub, (dims[i + 1], dims[i]), jnp.float32)      # (out, in)
        ws.append(jnp.asarray(w_pt).T.astype(jnp.bfloat16))        # (in, out)
        bs.append(jnp.zeros((1, dims[i + 1]), jnp.float32))
    key, sub = jax.random.split(key)
    wv = jnp.asarray(orth(sub, (1, dims[-1]), jnp.float32))        # (1, h2) row
    bv = jnp.zeros((1, 1), jnp.float32)
    return (ws[0], bs[0], ws[1], bs[1], wv, bv)


if __name__ == "__main__":
    key = jax.random.PRNGKey(0)
    B, obs_dim = 8, 32
    hidden_sizes = [32, 32]

    pkey, xkey = jax.random.split(key)
    params = init_critic_params(pkey, obs_dim, hidden_sizes)
    x = jax.random.normal(xkey, (B, obs_dim), dtype=jnp.float32)

    out = critic_forward(x, params)
    jax.block_until_ready(out)

    # Reference in plain JAX, mirroring the kernel's bf16-input / f32-accumulate math.
    w1, b1, w2, b2, wv, bv = params
    xb = x.astype(jnp.bfloat16)
    h = jnp.maximum(jnp.dot(xb, w1, preferred_element_type=jnp.float32) + b1, 0.0)
    h = jnp.maximum(jnp.dot(h.astype(jnp.bfloat16), w2,
                            preferred_element_type=jnp.float32) + b2, 0.0)
    ref = jnp.sum(h * wv, axis=-1) + bv[0, 0]

    assert out.shape == (B,)
    assert jnp.allclose(out, ref, atol=1e-4, rtol=1e-4), "mismatch vs reference"

    print("KERNEL_OK")
</pallas_src>

<mosaic_0001>
module attributes {stable_mosaic.version = 11 : i64} {
  func.func @_critic_kernel(%arg0: i32, %arg1: memref<8x32xbf16, #tpu.memory_space<vmem>>, %arg2: memref<32x32xbf16, #tpu.memory_space<vmem>>, %arg3: memref<1x32xf32, #tpu.memory_space<vmem>>, %arg4: memref<32x32xbf16, #tpu.memory_space<vmem>>, %arg5: memref<1x32xf32, #tpu.memory_space<vmem>>, %arg6: memref<1x32xf32, #tpu.memory_space<vmem>>, %arg7: memref<1x1xf32, #tpu.memory_space<vmem>>, %arg8: memref<8x1xf32, #tpu.memory_space<vmem>>) attributes {dimension_semantics = [#tpu.dimension_semantics<parallel>], iteration_bounds = array<i64: 1>, scalar_prefetch = 0 : i64, scratch_operands = 0 : i64, tpu.core_type = #tpu.core_type<tc>, window_params = [{transform_indices = @transform_0, window_bounds = array<i64: 8, 32>}, {pipeline_mode = #tpu.pipeline_mode<synchronous>, transform_indices = @transform_1, window_bounds = array<i64: 32, 32>}, {pipeline_mode = #tpu.pipeline_mode<synchronous>, transform_indices = @transform_2, window_bounds = array<i64: 1, 32>}, {pipeline_mode = #tpu.pipeline_mode<synchronous>, transform_indices = @transform_3, window_bounds = array<i64: 32, 32>}, {pipeline_mode = #tpu.pipeline_mode<synchronous>, transform_indices = @transform_4, window_bounds = array<i64: 1, 32>}, {pipeline_mode = #tpu.pipeline_mode<synchronous>, transform_indices = @transform_5, window_bounds = array<i64: 1, 32>}, {pipeline_mode = #tpu.pipeline_mode<synchronous>, transform_indices = @transform_6, window_bounds = array<i64: 1, 1>}, {transform_indices = @transform_7, window_bounds = array<i64: 8, 1>}]} {
    %c0 = arith.constant 0 : index
    %c0_0 = arith.constant 0 : index
    %0 = vector.load %arg1[%c0, %c0_0] : memref<8x32xbf16, #tpu.memory_space<vmem>>, vector<8x32xbf16>
    %c0_1 = arith.constant 0 : index
    %c0_2 = arith.constant 0 : index
    %1 = vector.load %arg2[%c0_1, %c0_2] : memref<32x32xbf16, #tpu.memory_space<vmem>>, vector<32x32xbf16>
    %cst = arith.constant dense<0.000000e+00> : vector<8x32xf32>
    %2 = tpu.matmul %0, %1, %cst {dimension_numbers = #tpu.dot_dimension_numbers<[1], [0], [0], [1], [0, 0, 1, 1], [], []>} : vector<8x32xbf16>, vector<32x32xbf16>, vector<8x32xf32> -> vector<8x32xf32>
    %c0_3 = arith.constant 0 : index
    %c0_4 = arith.constant 0 : index
    %3 = vector.load %arg3[%c0_3, %c0_4] : memref<1x32xf32, #tpu.memory_space<vmem>>, vector<1x32xf32>
    %4 = vector.broadcast %3 : vector<1x32xf32> to vector<8x32xf32>
    %5 = arith.addf %2, %4 : vector<8x32xf32>
    %cst_5 = arith.constant 0.000000e+00 : f32
    %6 = vector.broadcast %cst_5 : f32 to vector<8x32xf32>
    %7 = arith.maximumf %5, %6 : vector<8x32xf32>
    %8 = arith.truncf %7 : vector<8x32xf32> to vector<8x32xbf16>
    %c0_6 = arith.constant 0 : index
    %c0_7 = arith.constant 0 : index
    %9 = vector.load %arg4[%c0_6, %c0_7] : memref<32x32xbf16, #tpu.memory_space<vmem>>, vector<32x32xbf16>
    %cst_8 = arith.constant dense<0.000000e+00> : vector<8x32xf32>
    %10 = tpu.matmul %8, %9, %cst_8 {dimension_numbers = #tpu.dot_dimension_numbers<[1], [0], [0], [1], [0, 0, 1, 1], [], []>} : vector<8x32xbf16>, vector<32x32xbf16>, vector<8x32xf32> -> vector<8x32xf32>
    %c0_9 = arith.constant 0 : index
    %c0_10 = arith.constant 0 : index
    %11 = vector.load %arg5[%c0_9, %c0_10] : memref<1x32xf32, #tpu.memory_space<vmem>>, vector<1x32xf32>
    %12 = vector.broadcast %11 : vector<1x32xf32> to vector<8x32xf32>
    %13 = arith.addf %10, %12 : vector<8x32xf32>
    %cst_11 = arith.constant 0.000000e+00 : f32
    %14 = vector.broadcast %cst_11 : f32 to vector<8x32xf32>
    %15 = arith.maximumf %13, %14 : vector<8x32xf32>
    %c0_12 = arith.constant 0 : index
    %c0_13 = arith.constant 0 : index
    %16 = vector.load %arg6[%c0_12, %c0_13] : memref<1x32xf32, #tpu.memory_space<vmem>>, vector<1x32xf32>
    %17 = vector.broadcast %16 : vector<1x32xf32> to vector<8x32xf32>
    %18 = arith.mulf %15, %17 : vector<8x32xf32>
    %cst_14 = arith.constant dense<0.000000e+00> : vector<8xf32>
    %19 = vector.multi_reduction <add>, %18, %cst_14 [1] : vector<8x32xf32> to vector<8xf32>
    %20 = vector.shape_cast %19 : vector<8xf32> to vector<8x1xf32>
    %c0_15 = arith.constant 0 : index
    %c0_16 = arith.constant 0 : index
    %21 = vector.load %arg7[%c0_15, %c0_16] : memref<1x1xf32, #tpu.memory_space<vmem>>, vector<1x1xf32>
    %22 = vector.broadcast %21 : vector<1x1xf32> to vector<8x1xf32>
    %23 = arith.addf %20, %22 : vector<8x1xf32>
    %c0_17 = arith.constant 0 : index
    %c0_18 = arith.constant 0 : index
    %24 = vector.load %arg8[%c0_17, %c0_18] : memref<8x1xf32, #tpu.memory_space<vmem>>, vector<8x1xf32>
    tpu.vector_store %arg8[%c0_17, %c0_18], %23 {strides = array<i32>} : memref<8x1xf32, #tpu.memory_space<vmem>>, vector<8x1xf32>,
    return
  }
  func.func @transform_0(%arg0: i32) -> (i32, i32) {
    %c0_i32 = arith.constant 0 : i32
    %c0_i32_0 = arith.constant 0 : i32
    return %arg0, %c0_i32 : i32, i32
  }
  func.func @transform_1(%arg0: i32) -> (i32, i32) {
    %c0_i32 = arith.constant 0 : i32
    %c0_i32_0 = arith.constant 0 : i32
    %c0_i32_1 = arith.constant 0 : i32
    return %c0_i32, %c0_i32_0 : i32, i32
  }
  func.func @transform_2(%arg0: i32) -> (i32, i32) {
    %c0_i32 = arith.constant 0 : i32
    %c0_i32_0 = arith.constant 0 : i32
    %c0_i32_1 = arith.constant 0 : i32
    return %c0_i32, %c0_i32_0 : i32, i32
  }
  func.func @transform_3(%arg0: i32) -> (i32, i32) {
    %c0_i32 = arith.constant 0 : i32
    %c0_i32_0 = arith.constant 0 : i32
    %c0_i32_1 = arith.constant 0 : i32
    return %c0_i32, %c0_i32_0 : i32, i32
  }
  func.func @transform_4(%arg0: i32) -> (i32, i32) {
    %c0_i32 = arith.constant 0 : i32
    %c0_i32_0 = arith.constant 0 : i32
    %c0_i32_1 = arith.constant 0 : i32
    return %c0_i32, %c0_i32_0 : i32, i32
  }
  func.func @transform_5(%arg0: i32) -> (i32, i32) {
    %c0_i32 = arith.constant 0 : i32
    %c0_i32_0 = arith.constant 0 : i32
    %c0_i32_1 = arith.constant 0 : i32
    return %c0_i32, %c0_i32_0 : i32, i32
  }
  func.func @transform_6(%arg0: i32) -> (i32, i32) {
    %c0_i32 = arith.constant 0 : i32
    %c0_i32_0 = arith.constant 0 : i32
    %c0_i32_1 = arith.constant 0 : i32
    return %c0_i32, %c0_i32_0 : i32, i32
  }
  func.func @transform_7(%arg0: i32) -> (i32, i32) {
    %c0_i32 = arith.constant 0 : i32
    %c0_i32_0 = arith.constant 0 : i32
    return %arg0, %c0_i32 : i32, i32
  }
}

</mosaic_0001>

<bundles_post_ra>
// kernel: tpu_custom_call.1
= control target key start
LH: loop header
LB: loop body
LE: loop exit
PB: predicated region body
PF: predicated region fallthrough
CT: control target
= control target key end

     0   :  { %s413_s0 = inlined_call_operand.hbm [shape: bf16[8,32], index: 0, kind: input, shape index: {}]   ;;  %s414_s1 = inlined_call_operand.hbm [shape: bf16[32,32], index: 1, kind: input, shape index: {}]   ;;  %s415_s2 = inlined_call_operand.vmem [shape: f32[1,32], index: 2, kind: input, shape index: {}]   ;;  %s416_s3 = inlined_call_operand.hbm [shape: bf16[32,32], index: 3, kind: input, shape index: {}]   ;;  %s417_s4 = inlined_call_operand.vmem [shape: f32[1,32], index: 4, kind: input, shape index: {}]   ;;  %s418_s5 = inlined_call_operand.vmem [shape: f32[1,32], index: 5, kind: input, shape index: {}]   ;;  %s419_s6 = inlined_call_operand.<no memory space> [shape: f32[1,1], index: 6, kind: input, shape index: {}]   ;;  %s420_s7 = inlined_call_operand.vmem [shape: f32[8,1], index: 7, kind: output, shape index: {}]  }
   0x1   :  { %v12_v0 = vstv %s419_s6 }
   0x2   :  { %13 = vst [vmem:[#allocation2] sm:$0x1] %v12_v0 }
   0x3   :  { %14 = vsyncpa [#allocation4], 0 }
   0x4   :  { %15 = vsyncpa [#allocation6], 0  ;;  %s339_s26 = smov [#allocation5]  }
   0x5   :  { %s31_s27 = sshll.u32 %s339_s26, 4  ;;  %s32_s27 = int_to_ptr.vmem [resolvable:$true] %s31_s27 }
   0x6   :  { %s283_s28 = scalar_lea.vmem %s32_s27, 256  ;;  %p288_p1 = scmp.lt.s32.totalorder %s32_s27, %s32_s27 }
   0x7   :  { %p284_p0 = scmp.ne.s32.totalorder %s32_s27, %s283_s28  ;;  %p289_p2 = scmp.lt.s32.totalorder %s283_s28, %s283_s28 }
   0x9   :  { %p290_p3 = por %p289_p2, %p288_p1 }
   0xb   :  { %p291_p4 = pnand %p290_p3, %p284_p0 }
   0xd   :  { %294 = shalt.err (!%p291_p4)
}
   0xe   :  { %s340_s29 = smov 64   ;;  %s341_s30 = smov 4  }
   0xf   :  { %37 = dma.hbm_to_vmem [thread:$0]  %s414_s1, 256, %s32_s27, [#allocation6], %s340_s29, %s340_s29, %s341_s30  }
  0x10   :  { %s342_s6 = smov [#allocation3]   ;;  %s343_s11 = smov [#allocation7]  }
  0x11   :  { %s22_s10 = sshll.u32 %s342_s6, 4  ;;  %s45_s12 = sshll.u32 %s343_s11, 4  ;;  %s23_s10 = int_to_ptr.vmem [resolvable:$true] %s22_s10  ;;  %s46_s12 = int_to_ptr.vmem [resolvable:$true] %s45_s12 }
  0x12   :  { %s303_s13 = scalar_lea.vmem %s23_s10, 64  ;;  %p308_p6 = scmp.lt.s32.totalorder %s23_s10, %s23_s10 }
  0x13   :  { %p304_p5 = scmp.ne.s32.totalorder %s23_s10, %s303_s13  ;;  %p309_p7 = scmp.lt.s32.totalorder %s303_s13, %s303_s13 }
  0x15   :  { %p310_p8 = por %p309_p7, %p308_p6 }
  0x17   :  { %p311_p9 = pnand %p310_p8, %p304_p5 }
  0x19   :  { %314 = shalt.err (!%p311_p9)
}
  0x1a   :  { %25 = dma.hbm_to_vmem [thread:$0]  %s413_s0, 64, %s23_s10, [#allocation4]  }
  0x1b   :  { %s323_s16 = scalar_lea.vmem %s46_s12, 256  ;;  %p328_p11 = scmp.lt.s32.totalorder %s46_s12, %s46_s12 }
  0x1c   :  { %p324_p10 = scmp.ne.s32.totalorder %s46_s12, %s323_s16  ;;  %p329_p12 = scmp.lt.s32.totalorder %s323_s16, %s323_s16 }
  0x1e   :  { %p330_p13 = por %p329_p12, %p328_p11 }
  0x20   :  { %p331_p0 = pnand %p330_p13, %p324_p10 }
  0x22   :  { %334 = shalt.err (!%p331_p0)
}
  0x23   :  { %51 = dma.hbm_to_vmem [thread:$0]  %s416_s3, 256, %s46_s12, [#allocation6], %s340_s29, %s340_s29, %s341_s30  }
  0x24   :  { %335 = dma.done.wait [#allocation4], 64  }
  0x25   :  { %336 = vsyncadd [#allocation4], 4294967232 }
  0x26   :  { %337 = dma.done.wait [#allocation6], 512  }
  0x27   :  { %338 = vsyncadd [#allocation6], 4294966784  ;;  %v344_v1 = vmov 0.0   ;;  %vm345_vm0 = vmmov 0   ;;  %v271_v2 = vld [vmem:[#allocation5 + $0x8] sm:$0xff]   ;;  %v272_v3 = vld [vmem:[#allocation5] sm:$0xff]  }
  0x28   :  { %248 = vmatprep.subr.bf16.mxu0 %v344_v1  ;;  %252 = vmatprep.mubr.msk.bf16.mxu0 %vm345_vm0, %v344_v1  ;;  %v68_v4 = vld [vmem:[#allocation3] sm:$0xf]  ;;  %vm92_vm1 = vcmask 261120   ;;  %v274_v6 = vld [vmem:[#allocation7] sm:$0xff]   ;;  %v232_v7 = vld [vmem:[%s415_s2] ss:$0 sm:$0xff] }
  0x29   :  { %256 = vmatprep.subr.bf16.mxu1 %v344_v1  ;;  %260 = vmatprep.mubr.msk.bf16.mxu1 %vm345_vm0, %v344_v1  ;;  %v273_v5 = vld [vmem:[#allocation7 + $0x8] sm:$0xff]   ;;  %vm224_vm2 = vcmask 7168  }
  0x2a   :  { %249 = vmatpush3.bf16.msra.mxu0 %v271_v2  ;;  %257 = vmatpush3.bf16.msra.mxu1 %v273_v5  ;;  %v236_v15 = vld [vmem:[%s417_s4] ss:$0 sm:$0xff] }
  0x2b   :  { %250 = vmatprep.subr.bf16.mxu0 %v344_v1  ;;  %258 = vmatprep.subr.bf16.mxu1 %v344_v1  ;;  %v240_v19 = vld [vmem:[%s418_s5] ss:$0 sm:$0xff] }
  0x2c   :  { %v241_v25 = vld [vmem:[#allocation2] ss:$0 sm:$0xff] }
  0x2e   :  { %251 = vmatpush3.bf16.msra.mxu0 %v272_v3  ;;  %259 = vmatpush3.bf16.msra.mxu1 %v274_v6 }
  0x31   :  { %253 = vmatmul.mubr.msk.bf16.vlgmr.msra.gmra.mxu0 %vm92_vm1, %v68_v4 }
  0xf1   :  { %v130_v8 = vpop.f32.mrf.mxu0 }
  0xf2   :  { %v131_v9 = vadd.f32 %v232_v7, %v130_v8 }
  0xf3   :  { %v254_v10 = vpop.f32.mrf.mxu0 }
  0xf4   :  { %v136_v11 = vmax.f32 %v131_v9, 0.0 }
  0xf5   :  { %v133_v12 = vpop.f32.mrf.mxu0 }
  0xf6   :  { %v137_v13 = vpack.c.bf16 %v136_v11, %v136_v11 }
  0xf7   :  { %v255_v14 = vpop.f32.mrf.mxu0 }
  0xf8   :  { %261 = vmatmul.mubr.msk.bf16.vlgmr.msra.gmra.mxu1 %vm92_vm1, %v137_v13 }
 0x1b8   :  { %v198_v16 = vpop.f32.mrf.mxu1 }
 0x1b9   :  { %v199_v17 = vadd.f32 %v236_v15, %v198_v16 }
 0x1ba   :  { %v262_v18 = vpop.f32.mrf.mxu1 }
 0x1bb   :  { %v204_v20 = vmax.f32 %v199_v17, 0.0 }
 0x1bc   :  { %v201_v21 = vpop.f32.mrf.mxu1 }
 0x1bd   :  { %v212_v22 = vmul.f32 %v240_v19, %v204_v20 }
 0x1be   :  { %v263_v23 = vpop.f32.mrf.mxu1 }
 0x1bf   :  { %v213_v24 = vsel %vm92_vm1, %v212_v22, 0.0 }
 0x1c0   :  { %214 = vadd.xlane.f32.xlu0 %v213_v24 }
 0x249   :  { %v215_v26 = vpop.xlane.xlu0 %214 }
 0x24a   :  { %v223_v27 = vadd.f32 %v241_v25, %v215_v26 }
 0x24c   :  { %225 = vst.msk [vmem:[%s420_s7] sm:$0xff] %vm224_vm2, %v223_v27 }
 0x24d   :  { %230 = vsyncpa [#allocation4], 1 }
 0x24e   :  { %231 = vsyncpa [#allocation6], 1 }

</bundles_post_ra>
